<compile_context>
chip_gen: v5e
topology: v5e:2x2
jax: 0.10.0
libtpu: 0.0.40
codegen_flags: <defaults>
</compile_context>

<pallas_src>
import functools

import jax
import jax.numpy as jnp
from jax import lax
from jax.experimental import pallas as pl
from jax.experimental.pallas import tpu as pltpu

INPUT_SIZE = 25
OUTPUT_SIZE = 1
LANES = 128          # fused head width: cols [0:H] hidden head, col [H] out head, rest 0
DEFAULT_CHUNK = 8    # time steps per grid iteration (inner loop is unrolled)


# ----------------------------------------------------------------------------
# Kernel: CHUNK recurrent steps per grid iteration, hidden carried in VMEM.
# ----------------------------------------------------------------------------
def _rnn_chunk_kernel(chunk, xz_ref, h0_ref, wh_ref, out_ref, h_scratch):
    c = pl.program_id(0)

    @pl.when(c == 0)
    def _init():
        # h0 is pre-padded to (B, LANES) on the host (zeros beyond H).
        h_scratch[...] = h0_ref[...]

    def step(s, carry):
        h = h_scratch[...]                     # (B, LANES)
        # z[:, :H] = new hidden,  z[:, H] = raw out logit (sigmoid in wrapper).
        # xz already contains x @ Wx + biases (hoisted out of the recurrence).
        z = xz_ref[s] + jnp.dot(h, wh_ref[...],
                                preferred_element_type=jnp.float32)
        # Carry the raw slab: columns >= H (incl. the logit) are neutralized
        # next step because wh rows >= H are exactly zero (see pack_params).
        h_scratch[...] = z
        out_ref[s] = z
        return carry

    lax.fori_loop(0, chunk, step, 0, unroll=True)


# ----------------------------------------------------------------------------
# Host-side parameter packing (once per model, outside the kernel)
# ----------------------------------------------------------------------------
def pack_params(params, hidden_size):
    """Build the fused, lane-padded weight slabs from nn.Linear-style params."""
    w_i2h, b_i2h, w_i2o, b_i2o = params   # (fan_in,H), (H,), (fan_in,1), (1,)
    H = hidden_size
    assert H + OUTPUT_SIZE <= LANES, "hidden_size + 1 must fit in one lane tile"

    # x-side weights + bias row (hit by the ones column appended to x).
    wx = jnp.zeros((INPUT_SIZE + 1, LANES), jnp.float32)
    wx = wx.at[:INPUT_SIZE, :H].set(w_i2h[:INPUT_SIZE])
    wx = wx.at[:INPUT_SIZE, H:H + OUTPUT_SIZE].set(w_i2o[:INPUT_SIZE])
    wx = wx.at[INPUT_SIZE, :H].set(b_i2h)
    wx = wx.at[INPUT_SIZE, H:H + OUTPUT_SIZE].set(b_i2o)

    # h-side weights, zero-padded to (LANES, LANES).  Rows >= H MUST stay zero:
    # that is what makes the carried slab's extra columns inert.
    wh = jnp.zeros((LANES, LANES), jnp.float32)
    wh = wh.at[:H, :H].set(w_i2h[INPUT_SIZE:])
    wh = wh.at[:H, H:H + OUTPUT_SIZE].set(w_i2o[INPUT_SIZE:])
    return wx, wh


# ----------------------------------------------------------------------------
# Wrappers
# ----------------------------------------------------------------------------
def rnn_forward_seq(xs, h0, params, *, chunk=DEFAULT_CHUNK):
    """Run the RNN cell over a whole sequence with one Pallas kernel.

    xs: (T, B, INPUT_SIZE) float32, h0: (B, H) float32.
    Returns (outs: (T, B, 1), final_hidden: (B, H)).
    """
    T, B, _ = xs.shape
    H = h0.shape[1]
    wx_cat, wh_pad = pack_params(params, H)

    # Hoisted input projection (one big lane-dense GEMM, biases folded via the
    # ones column); the recurrence only sees the precomputed (T, B, 128) slab.
    xs_aug = jnp.concatenate([xs, jnp.ones((T, B, 1), xs.dtype)], axis=-1)
    xz = jnp.einsum("tbi,io->tbo", xs_aug.astype(jnp.float32), wx_cat,
                    preferred_element_type=jnp.float32)          # (T, B, LANES)

    # Pad T to a multiple of the chunk size (padded steps see zero input and
    # are never read back).
    n_chunks = pl.cdiv(T, chunk)
    T_pad = n_chunks * chunk
    if T_pad != T:
        xz = jnp.concatenate(
            [xz, jnp.zeros((T_pad - T, B, LANES), jnp.float32)], axis=0)

    h0_pad = jnp.zeros((B, LANES), jnp.float32).at[:, :H].set(h0)

    out_slabs = pl.pallas_call(
        functools.partial(_rnn_chunk_kernel, chunk),
        out_shape=jax.ShapeDtypeStruct((T_pad, B, LANES), jnp.float32),
        grid=(n_chunks,),
        in_specs=[
            pl.BlockSpec((chunk, B, LANES), lambda c: (c, 0, 0)),   # xz chunk
            pl.BlockSpec((B, LANES), lambda c: (0, 0)),             # h0 (resident)
            pl.BlockSpec((LANES, LANES), lambda c: (0, 0)),         # Wh (resident)
        ],
        out_specs=pl.BlockSpec((chunk, B, LANES), lambda c: (c, 0, 0)),
        scratch_shapes=[pltpu.VMEM((B, LANES), jnp.float32)],       # carried h
        compiler_params=pltpu.CompilerParams(
            dimension_semantics=("arbitrary",),                     # time is sequential
            vmem_limit_bytes=32 << 20),                             # fits v7x's 64 MiB too
    )(xz, h0_pad, wh_pad)

    # Sigmoid only on the real logit column, once, outside the recurrence.
    outs = jax.nn.sigmoid(out_slabs[:T, :, H:H + OUTPUT_SIZE])      # (T, B, 1)
    final_hidden = out_slabs[T - 1, :, :H]                          # (B, H)
    return outs, final_hidden


def rnn_forward(x, h, params):
    """Single-step forward identical to the PyTorch module's forward()."""
    outs, new_h = rnn_forward_seq(x[None], h, params, chunk=1)
    return outs[0], new_h


# ----------------------------------------------------------------------------
# Init + pure-JAX reference
# ----------------------------------------------------------------------------
def init_params(key, hidden_size):
    """nn.Linear-style params: W stored as (in_features, out_features)."""
    fan_in = INPUT_SIZE + hidden_size
    bound = 1.0 / jnp.sqrt(jnp.float32(fan_in))
    k = jax.random.split(key, 4)
    w_i2h = jax.random.uniform(k[0], (fan_in, hidden_size), jnp.float32, -bound, bound)
    b_i2h = jax.random.uniform(k[1], (hidden_size,), jnp.float32, -bound, bound)
    w_i2o = jax.random.uniform(k[2], (fan_in, OUTPUT_SIZE), jnp.float32, -bound, bound)
    b_i2o = jax.random.uniform(k[3], (OUTPUT_SIZE,), jnp.float32, -bound, bound)
    return (w_i2h, b_i2h, w_i2o, b_i2o)


def reference_forward(x, h, params):
    w_i2h, b_i2h, w_i2o, b_i2o = params
    combined = jnp.concatenate([x, h], axis=1)
    new_h = combined @ w_i2h + b_i2h
    out = jax.nn.sigmoid(combined @ w_i2o + b_i2o)
    return out, new_h


def reference_forward_seq(xs, h0, params):
    def step(h, x):
        out, new_h = reference_forward(x, h, params)
        return new_h, out
    h_final, outs = jax.lax.scan(step, h0, xs)
    return outs, h_final


# ----------------------------------------------------------------------------
# Demo / self-check
# ----------------------------------------------------------------------------
if __name__ == "__main__":
    hidden_size = 32
    batch = 8      # multiple of 8 sublanes
    seq_len = 8

    key = jax.random.PRNGKey(0)
    k_param, k_x = jax.random.split(key, 2)

    params = init_params(k_param, hidden_size)
    xs = jax.random.normal(k_x, (seq_len, batch, INPUT_SIZE), jnp.float32)
    h0 = jnp.zeros((batch, hidden_size), jnp.float32)   # init_hidden(), batched

    # Fused whole-sequence kernel (one chunk of 8 steps here).
    outs, h_final = rnn_forward_seq(xs, h0, params)
    outs = jax.block_until_ready(outs)
    h_final = jax.block_until_ready(h_final)

    outs_ref, h_final_ref = reference_forward_seq(xs, h0, params)
    assert outs.shape == (seq_len, batch, OUTPUT_SIZE)
    assert h_final.shape == (batch, hidden_size)
    assert jnp.allclose(outs, outs_ref, atol=1e-5, rtol=1e-5)
    assert jnp.allclose(h_final, h_final_ref, atol=1e-5, rtol=1e-5)

    # Single-step path (exact module semantics: forward(input, hidden)).
    out1, newh1 = rnn_forward(xs[0], h0, params)
    out1 = jax.block_until_ready(out1)
    out1_ref, newh1_ref = reference_forward(xs[0], h0, params)
    assert jnp.allclose(out1, out1_ref, atol=1e-5, rtol=1e-5)
    assert jnp.allclose(newh1, newh1_ref, atol=1e-5, rtol=1e-5)

    print("KERNEL_OK")
</pallas_src>

<mosaic_0001>
module attributes {stable_mosaic.version = 11 : i64} {
  func.func @_rnn_chunk_kernel(%arg0: i32, %arg1: memref<8x8x128xf32, #tpu.memory_space<vmem>>, %arg2: memref<8x128xf32, #tpu.memory_space<vmem>>, %arg3: memref<128x128xf32, #tpu.memory_space<vmem>>, %arg4: memref<8x8x128xf32, #tpu.memory_space<vmem>>, %arg5: memref<8x128xf32, #tpu.memory_space<vmem>>) attributes {dimension_semantics = [#tpu.dimension_semantics<arbitrary>], iteration_bounds = array<i64: 1>, scalar_prefetch = 0 : i64, scratch_operands = 1 : i64, tpu.core_type = #tpu.core_type<tc>, window_params = [{transform_indices = @transform_0, window_bounds = array<i64: 8, 8, 128>}, {pipeline_mode = #tpu.pipeline_mode<synchronous>, transform_indices = @transform_1, window_bounds = array<i64: 8, 128>}, {pipeline_mode = #tpu.pipeline_mode<synchronous>, transform_indices = @transform_2, window_bounds = array<i64: 128, 128>}, {transform_indices = @transform_3, window_bounds = array<i64: 8, 8, 128>}]} {
    %c0_i32 = arith.constant 0 : i32
    %0 = arith.cmpi eq, %arg0, %c0_i32 : i32
    %1 = arith.extui %0 : i1 to i32
    %c0_i32_0 = arith.constant 0 : i32
    %2 = arith.cmpi ne, %1, %c0_i32_0 : i32
    scf.if %2 {
      %c0_88 = arith.constant 0 : index
      %c0_89 = arith.constant 0 : index
      %99 = vector.load %arg2[%c0_88, %c0_89] : memref<8x128xf32, #tpu.memory_space<vmem>>, vector<8x128xf32>
      %c0_90 = arith.constant 0 : index
      %c0_91 = arith.constant 0 : index
      %100 = vector.load %arg5[%c0_90, %c0_91] : memref<8x128xf32, #tpu.memory_space<vmem>>, vector<8x128xf32>
      tpu.vector_store %arg5[%c0_90, %c0_91], %99 {strides = array<i32>} : memref<8x128xf32, #tpu.memory_space<vmem>>, vector<8x128xf32>,
    } else {
    }
    %c0_i32_1 = arith.constant 0 : i32
    %c0 = arith.constant 0 : index
    %c0_2 = arith.constant 0 : index
    %3 = vector.load %arg5[%c0, %c0_2] : memref<8x128xf32, #tpu.memory_space<vmem>>, vector<8x128xf32>
    %4 = arith.index_cast %c0_i32_1 : i32 to index
    %c0_3 = arith.constant 0 : index
    %c0_4 = arith.constant 0 : index
    %5 = vector.load %arg1[%4, %c0_3, %c0_4] : memref<8x8x128xf32, #tpu.memory_space<vmem>>, vector<1x8x128xf32>
    %6 = vector.shape_cast %5 : vector<1x8x128xf32> to vector<8x128xf32>
    %c0_5 = arith.constant 0 : index
    %c0_6 = arith.constant 0 : index
    %7 = vector.load %arg3[%c0_5, %c0_6] : memref<128x128xf32, #tpu.memory_space<vmem>>, vector<128x128xf32>
    %cst = arith.constant dense<0.000000e+00> : vector<8x128xf32>
    %8 = tpu.matmul %3, %7, %cst {dimension_numbers = #tpu.dot_dimension_numbers<[1], [0], [0], [1], [0, 0, 1, 1], [], []>} : vector<8x128xf32>, vector<128x128xf32>, vector<8x128xf32> -> vector<8x128xf32>
    %9 = arith.addf %6, %8 : vector<8x128xf32>
    %c0_7 = arith.constant 0 : index
    %c0_8 = arith.constant 0 : index
    %10 = vector.load %arg5[%c0_7, %c0_8] : memref<8x128xf32, #tpu.memory_space<vmem>>, vector<8x128xf32>
    tpu.vector_store %arg5[%c0_7, %c0_8], %9 {strides = array<i32>} : memref<8x128xf32, #tpu.memory_space<vmem>>, vector<8x128xf32>,
    %11 = arith.index_cast %c0_i32_1 : i32 to index
    %c0_9 = arith.constant 0 : index
    %c0_10 = arith.constant 0 : index
    %12 = vector.load %arg4[%11, %c0_9, %c0_10] : memref<8x8x128xf32, #tpu.memory_space<vmem>>, vector<1x8x128xf32>
    %13 = vector.shape_cast %12 : vector<1x8x128xf32> to vector<8x128xf32>
    %14 = vector.shape_cast %9 : vector<8x128xf32> to vector<1x8x128xf32>
    tpu.vector_store %arg4[%11, %c0_9, %c0_10], %14 {strides = array<i32>} : memref<8x8x128xf32, #tpu.memory_space<vmem>>, vector<1x8x128xf32>,
    %c1_i32 = arith.constant 1 : i32
    %c0_11 = arith.constant 0 : index
    %c0_12 = arith.constant 0 : index
    %15 = vector.load %arg5[%c0_11, %c0_12] : memref<8x128xf32, #tpu.memory_space<vmem>>, vector<8x128xf32>
    %16 = arith.index_cast %c1_i32 : i32 to index
    %c0_13 = arith.constant 0 : index
    %c0_14 = arith.constant 0 : index
    %17 = vector.load %arg1[%16, %c0_13, %c0_14] : memref<8x8x128xf32, #tpu.memory_space<vmem>>, vector<1x8x128xf32>
    %18 = vector.shape_cast %17 : vector<1x8x128xf32> to vector<8x128xf32>
    %c0_15 = arith.constant 0 : index
    %c0_16 = arith.constant 0 : index
    %19 = vector.load %arg3[%c0_15, %c0_16] : memref<128x128xf32, #tpu.memory_space<vmem>>, vector<128x128xf32>
    %cst_17 = arith.constant dense<0.000000e+00> : vector<8x128xf32>
    %20 = tpu.matmul %15, %19, %cst_17 {dimension_numbers = #tpu.dot_dimension_numbers<[1], [0], [0], [1], [0, 0, 1, 1], [], []>} : vector<8x128xf32>, vector<128x128xf32>, vector<8x128xf32> -> vector<8x128xf32>
    %21 = arith.addf %18, %20 : vector<8x128xf32>
    %c0_18 = arith.constant 0 : index
    %c0_19 = arith.constant 0 : index
    %22 = vector.load %arg5[%c0_18, %c0_19] : memref<8x128xf32, #tpu.memory_space<vmem>>, vector<8x128xf32>
    tpu.vector_store %arg5[%c0_18, %c0_19], %21 {strides = array<i32>} : memref<8x128xf32, #tpu.memory_space<vmem>>, vector<8x128xf32>,
    %23 = arith.index_cast %c1_i32 : i32 to index
    %c0_20 = arith.constant 0 : index
    %c0_21 = arith.constant 0 : index
    %24 = vector.load %arg4[%23, %c0_20, %c0_21] : memref<8x8x128xf32, #tpu.memory_space<vmem>>, vector<1x8x128xf32>
    %25 = vector.shape_cast %24 : vector<1x8x128xf32> to vector<8x128xf32>
    %26 = vector.shape_cast %21 : vector<8x128xf32> to vector<1x8x128xf32>
    tpu.vector_store %arg4[%23, %c0_20, %c0_21], %26 {strides = array<i32>} : memref<8x8x128xf32, #tpu.memory_space<vmem>>, vector<1x8x128xf32>,
    %c2_i32 = arith.constant 2 : i32
    %c0_22 = arith.constant 0 : index
    %c0_23 = arith.constant 0 : index
    %27 = vector.load %arg5[%c0_22, %c0_23] : memref<8x128xf32, #tpu.memory_space<vmem>>, vector<8x128xf32>
    %28 = arith.index_cast %c2_i32 : i32 to index
    %c0_24 = arith.constant 0 : index
    %c0_25 = arith.constant 0 : index
    %29 = vector.load %arg1[%28, %c0_24, %c0_25] : memref<8x8x128xf32, #tpu.memory_space<vmem>>, vector<1x8x128xf32>
    %30 = vector.shape_cast %29 : vector<1x8x128xf32> to vector<8x128xf32>
    %c0_26 = arith.constant 0 : index
    %c0_27 = arith.constant 0 : index
    %31 = vector.load %arg3[%c0_26, %c0_27] : memref<128x128xf32, #tpu.memory_space<vmem>>, vector<128x128xf32>
    %cst_28 = arith.constant dense<0.000000e+00> : vector<8x128xf32>
    %32 = tpu.matmul %27, %31, %cst_28 {dimension_numbers = #tpu.dot_dimension_numbers<[1], [0], [0], [1], [0, 0, 1, 1], [], []>} : vector<8x128xf32>, vector<128x128xf32>, vector<8x128xf32> -> vector<8x128xf32>
    %33 = arith.addf %30, %32 : vector<8x128xf32>
    %c0_29 = arith.constant 0 : index
    %c0_30 = arith.constant 0 : index
    %34 = vector.load %arg5[%c0_29, %c0_30] : memref<8x128xf32, #tpu.memory_space<vmem>>, vector<8x128xf32>
    tpu.vector_store %arg5[%c0_29, %c0_30], %33 {strides = array<i32>} : memref<8x128xf32, #tpu.memory_space<vmem>>, vector<8x128xf32>,
    %35 = arith.index_cast %c2_i32 : i32 to index
    %c0_31 = arith.constant 0 : index
    %c0_32 = arith.constant 0 : index
    %36 = vector.load %arg4[%35, %c0_31, %c0_32] : memref<8x8x128xf32, #tpu.memory_space<vmem>>, vector<1x8x128xf32>
    %37 = vector.shape_cast %36 : vector<1x8x128xf32> to vector<8x128xf32>
    %38 = vector.shape_cast %33 : vector<8x128xf32> to vector<1x8x128xf32>
    tpu.vector_store %arg4[%35, %c0_31, %c0_32], %38 {strides = array<i32>} : memref<8x8x128xf32, #tpu.memory_space<vmem>>, vector<1x8x128xf32>,
    %c3_i32 = arith.constant 3 : i32
    %c0_33 = arith.constant 0 : index
    %c0_34 = arith.constant 0 : index
    %39 = vector.load %arg5[%c0_33, %c0_34] : memref<8x128xf32, #tpu.memory_space<vmem>>, vector<8x128xf32>
    %40 = arith.index_cast %c3_i32 : i32 to index
    %c0_35 = arith.constant 0 : index
    %c0_36 = arith.constant 0 : index
    %41 = vector.load %arg1[%40, %c0_35, %c0_36] : memref<8x8x128xf32, #tpu.memory_space<vmem>>, vector<1x8x128xf32>
    %42 = vector.shape_cast %41 : vector<1x8x128xf32> to vector<8x128xf32>
    %c0_37 = arith.constant 0 : index
    %c0_38 = arith.constant 0 : index
    %43 = vector.load %arg3[%c0_37, %c0_38] : memref<128x128xf32, #tpu.memory_space<vmem>>, vector<128x128xf32>
    %cst_39 = arith.constant dense<0.000000e+00> : vector<8x128xf32>
    %44 = tpu.matmul %39, %43, %cst_39 {dimension_numbers = #tpu.dot_dimension_numbers<[1], [0], [0], [1], [0, 0, 1, 1], [], []>} : vector<8x128xf32>, vector<128x128xf32>, vector<8x128xf32> -> vector<8x128xf32>
    %45 = arith.addf %42, %44 : vector<8x128xf32>
    %c0_40 = arith.constant 0 : index
    %c0_41 = arith.constant 0 : index
    %46 = vector.load %arg5[%c0_40, %c0_41] : memref<8x128xf32, #tpu.memory_space<vmem>>, vector<8x128xf32>
    tpu.vector_store %arg5[%c0_40, %c0_41], %45 {strides = array<i32>} : memref<8x128xf32, #tpu.memory_space<vmem>>, vector<8x128xf32>,
    %47 = arith.index_cast %c3_i32 : i32 to index
    %c0_42 = arith.constant 0 : index
    %c0_43 = arith.constant 0 : index
    %48 = vector.load %arg4[%47, %c0_42, %c0_43] : memref<8x8x128xf32, #tpu.memory_space<vmem>>, vector<1x8x128xf32>
    %49 = vector.shape_cast %48 : vector<1x8x128xf32> to vector<8x128xf32>
    %50 = vector.shape_cast %45 : vector<8x128xf32> to vector<1x8x128xf32>
    tpu.vector_store %arg4[%47, %c0_42, %c0_43], %50 {strides = array<i32>} : memref<8x8x128xf32, #tpu.memory_space<vmem>>, vector<1x8x128xf32>,
    %c4_i32 = arith.constant 4 : i32
    %c0_44 = arith.constant 0 : index
    %c0_45 = arith.constant 0 : index
    %51 = vector.load %arg5[%c0_44, %c0_45] : memref<8x128xf32, #tpu.memory_space<vmem>>, vector<8x128xf32>
    %52 = arith.index_cast %c4_i32 : i32 to index
    %c0_46 = arith.constant 0 : index
    %c0_47 = arith.constant 0 : index
    %53 = vector.load %arg1[%52, %c0_46, %c0_47] : memref<8x8x128xf32, #tpu.memory_space<vmem>>, vector<1x8x128xf32>
    %54 = vector.shape_cast %53 : vector<1x8x128xf32> to vector<8x128xf32>
    %c0_48 = arith.constant 0 : index
    %c0_49 = arith.constant 0 : index
    %55 = vector.load %arg3[%c0_48, %c0_49] : memref<128x128xf32, #tpu.memory_space<vmem>>, vector<128x128xf32>
    %cst_50 = arith.constant dense<0.000000e+00> : vector<8x128xf32>
    %56 = tpu.matmul %51, %55, %cst_50 {dimension_numbers = #tpu.dot_dimension_numbers<[1], [0], [0], [1], [0, 0, 1, 1], [], []>} : vector<8x128xf32>, vector<128x128xf32>, vector<8x128xf32> -> vector<8x128xf32>
    %57 = arith.addf %54, %56 : vector<8x128xf32>
    %c0_51 = arith.constant 0 : index
    %c0_52 = arith.constant 0 : index
    %58 = vector.load %arg5[%c0_51, %c0_52] : memref<8x128xf32, #tpu.memory_space<vmem>>, vector<8x128xf32>
    tpu.vector_store %arg5[%c0_51, %c0_52], %57 {strides = array<i32>} : memref<8x128xf32, #tpu.memory_space<vmem>>, vector<8x128xf32>,
    %59 = arith.index_cast %c4_i32 : i32 to index
    %c0_53 = arith.constant 0 : index
    %c0_54 = arith.constant 0 : index
    %60 = vector.load %arg4[%59, %c0_53, %c0_54] : memref<8x8x128xf32, #tpu.memory_space<vmem>>, vector<1x8x128xf32>
    %61 = vector.shape_cast %60 : vector<1x8x128xf32> to vector<8x128xf32>
    %62 = vector.shape_cast %57 : vector<8x128xf32> to vector<1x8x128xf32>
    tpu.vector_store %arg4[%59, %c0_53, %c0_54], %62 {strides = array<i32>} : memref<8x8x128xf32, #tpu.memory_space<vmem>>, vector<1x8x128xf32>,
    %c5_i32 = arith.constant 5 : i32
    %c0_55 = arith.constant 0 : index
    %c0_56 = arith.constant 0 : index
    %63 = vector.load %arg5[%c0_55, %c0_56] : memref<8x128xf32, #tpu.memory_space<vmem>>, vector<8x128xf32>
    %64 = arith.index_cast %c5_i32 : i32 to index
    %c0_57 = arith.constant 0 : index
    %c0_58 = arith.constant 0 : index
    %65 = vector.load %arg1[%64, %c0_57, %c0_58] : memref<8x8x128xf32, #tpu.memory_space<vmem>>, vector<1x8x128xf32>
    %66 = vector.shape_cast %65 : vector<1x8x128xf32> to vector<8x128xf32>
    %c0_59 = arith.constant 0 : index
    %c0_60 = arith.constant 0 : index
    %67 = vector.load %arg3[%c0_59, %c0_60] : memref<128x128xf32, #tpu.memory_space<vmem>>, vector<128x128xf32>
    %cst_61 = arith.constant dense<0.000000e+00> : vector<8x128xf32>
    %68 = tpu.matmul %63, %67, %cst_61 {dimension_numbers = #tpu.dot_dimension_numbers<[1], [0], [0], [1], [0, 0, 1, 1], [], []>} : vector<8x128xf32>, vector<128x128xf32>, vector<8x128xf32> -> vector<8x128xf32>
    %69 = arith.addf %66, %68 : vector<8x128xf32>
    %c0_62 = arith.constant 0 : index
    %c0_63 = arith.constant 0 : index
    %70 = vector.load %arg5[%c0_62, %c0_63] : memref<8x128xf32, #tpu.memory_space<vmem>>, vector<8x128xf32>
    tpu.vector_store %arg5[%c0_62, %c0_63], %69 {strides = array<i32>} : memref<8x128xf32, #tpu.memory_space<vmem>>, vector<8x128xf32>,
    %71 = arith.index_cast %c5_i32 : i32 to index
    %c0_64 = arith.constant 0 : index
    %c0_65 = arith.constant 0 : index
    %72 = vector.load %arg4[%71, %c0_64, %c0_65] : memref<8x8x128xf32, #tpu.memory_space<vmem>>, vector<1x8x128xf32>
    %73 = vector.shape_cast %72 : vector<1x8x128xf32> to vector<8x128xf32>
    %74 = vector.shape_cast %69 : vector<8x128xf32> to vector<1x8x128xf32>
    tpu.vector_store %arg4[%71, %c0_64, %c0_65], %74 {strides = array<i32>} : memref<8x8x128xf32, #tpu.memory_space<vmem>>, vector<1x8x128xf32>,
    %c6_i32 = arith.constant 6 : i32
    %c0_66 = arith.constant 0 : index
    %c0_67 = arith.constant 0 : index
    %75 = vector.load %arg5[%c0_66, %c0_67] : memref<8x128xf32, #tpu.memory_space<vmem>>, vector<8x128xf32>
    %76 = arith.index_cast %c6_i32 : i32 to index
    %c0_68 = arith.constant 0 : index
    %c0_69 = arith.constant 0 : index
    %77 = vector.load %arg1[%76, %c0_68, %c0_69] : memref<8x8x128xf32, #tpu.memory_space<vmem>>, vector<1x8x128xf32>
    %78 = vector.shape_cast %77 : vector<1x8x128xf32> to vector<8x128xf32>
    %c0_70 = arith.constant 0 : index
    %c0_71 = arith.constant 0 : index
    %79 = vector.load %arg3[%c0_70, %c0_71] : memref<128x128xf32, #tpu.memory_space<vmem>>, vector<128x128xf32>
    %cst_72 = arith.constant dense<0.000000e+00> : vector<8x128xf32>
    %80 = tpu.matmul %75, %79, %cst_72 {dimension_numbers = #tpu.dot_dimension_numbers<[1], [0], [0], [1], [0, 0, 1, 1], [], []>} : vector<8x128xf32>, vector<128x128xf32>, vector<8x128xf32> -> vector<8x128xf32>
    %81 = arith.addf %78, %80 : vector<8x128xf32>
    %c0_73 = arith.constant 0 : index
    %c0_74 = arith.constant 0 : index
    %82 = vector.load %arg5[%c0_73, %c0_74] : memref<8x128xf32, #tpu.memory_space<vmem>>, vector<8x128xf32>
    tpu.vector_store %arg5[%c0_73, %c0_74], %81 {strides = array<i32>} : memref<8x128xf32, #tpu.memory_space<vmem>>, vector<8x128xf32>,
    %83 = arith.index_cast %c6_i32 : i32 to index
    %c0_75 = arith.constant 0 : index
    %c0_76 = arith.constant 0 : index
    %84 = vector.load %arg4[%83, %c0_75, %c0_76] : memref<8x8x128xf32, #tpu.memory_space<vmem>>, vector<1x8x128xf32>
    %85 = vector.shape_cast %84 : vector<1x8x128xf32> to vector<8x128xf32>
    %86 = vector.shape_cast %81 : vector<8x128xf32> to vector<1x8x128xf32>
    tpu.vector_store %arg4[%83, %c0_75, %c0_76], %86 {strides = array<i32>} : memref<8x8x128xf32, #tpu.memory_space<vmem>>, vector<1x8x128xf32>,
    %c7_i32 = arith.constant 7 : i32
    %c0_77 = arith.constant 0 : index
    %c0_78 = arith.constant 0 : index
    %87 = vector.load %arg5[%c0_77, %c0_78] : memref<8x128xf32, #tpu.memory_space<vmem>>, vector<8x128xf32>
    %88 = arith.index_cast %c7_i32 : i32 to index
    %c0_79 = arith.constant 0 : index
    %c0_80 = arith.constant 0 : index
    %89 = vector.load %arg1[%88, %c0_79, %c0_80] : memref<8x8x128xf32, #tpu.memory_space<vmem>>, vector<1x8x128xf32>
    %90 = vector.shape_cast %89 : vector<1x8x128xf32> to vector<8x128xf32>
    %c0_81 = arith.constant 0 : index
    %c0_82 = arith.constant 0 : index
    %91 = vector.load %arg3[%c0_81, %c0_82] : memref<128x128xf32, #tpu.memory_space<vmem>>, vector<128x128xf32>
    %cst_83 = arith.constant dense<0.000000e+00> : vector<8x128xf32>
    %92 = tpu.matmul %87, %91, %cst_83 {dimension_numbers = #tpu.dot_dimension_numbers<[1], [0], [0], [1], [0, 0, 1, 1], [], []>} : vector<8x128xf32>, vector<128x128xf32>, vector<8x128xf32> -> vector<8x128xf32>
    %93 = arith.addf %90, %92 : vector<8x128xf32>
    %c0_84 = arith.constant 0 : index
    %c0_85 = arith.constant 0 : index
    %94 = vector.load %arg5[%c0_84, %c0_85] : memref<8x128xf32, #tpu.memory_space<vmem>>, vector<8x128xf32>
    tpu.vector_store %arg5[%c0_84, %c0_85], %93 {strides = array<i32>} : memref<8x128xf32, #tpu.memory_space<vmem>>, vector<8x128xf32>,
    %95 = arith.index_cast %c7_i32 : i32 to index
    %c0_86 = arith.constant 0 : index
    %c0_87 = arith.constant 0 : index
    %96 = vector.load %arg4[%95, %c0_86, %c0_87] : memref<8x8x128xf32, #tpu.memory_space<vmem>>, vector<1x8x128xf32>
    %97 = vector.shape_cast %96 : vector<1x8x128xf32> to vector<8x128xf32>
    %98 = vector.shape_cast %93 : vector<8x128xf32> to vector<1x8x128xf32>
    tpu.vector_store %arg4[%95, %c0_86, %c0_87], %98 {strides = array<i32>} : memref<8x8x128xf32, #tpu.memory_space<vmem>>, vector<1x8x128xf32>,
    %c8_i32 = arith.constant 8 : i32
    return
  }
  func.func @transform_0(%arg0: i32) -> (i32, i32, i32) {
    %c0_i32 = arith.constant 0 : i32
    %c0_i32_0 = arith.constant 0 : i32
    %c0_i32_1 = arith.constant 0 : i32
    return %arg0, %c0_i32, %c0_i32_0 : i32, i32, i32
  }
  func.func @transform_1(%arg0: i32) -> (i32, i32) {
    %c0_i32 = arith.constant 0 : i32
    %c0_i32_0 = arith.constant 0 : i32
    %c0_i32_1 = arith.constant 0 : i32
    return %c0_i32, %c0_i32_0 : i32, i32
  }
  func.func @transform_2(%arg0: i32) -> (i32, i32) {
    %c0_i32 = arith.constant 0 : i32
    %c0_i32_0 = arith.constant 0 : i32
    %c0_i32_1 = arith.constant 0 : i32
    return %c0_i32, %c0_i32_0 : i32, i32
  }
  func.func @transform_3(%arg0: i32) -> (i32, i32, i32) {
    %c0_i32 = arith.constant 0 : i32
    %c0_i32_0 = arith.constant 0 : i32
    %c0_i32_1 = arith.constant 0 : i32
    return %arg0, %c0_i32, %c0_i32_0 : i32, i32, i32
  }
}

</mosaic_0001>

<bundles_post_ra>
// kernel: tpu_custom_call.1
= control target key start
LH: loop header
LB: loop body
LE: loop exit
PB: predicated region body
PF: predicated region fallthrough
CT: control target
= control target key end

     0   :  { %8 = vsyncpa [#allocation4], 0  ;;  %s743_s0 = inlined_call_operand.hbm [shape: f32[8,8,128], index: 0, kind: input, shape index: {}]   ;;  %s744_s1 = inlined_call_operand.hbm [shape: f32[8,128], index: 1, kind: input, shape index: {}]   ;;  %s745_s2 = inlined_call_operand.hbm [shape: f32[128,128], index: 2, kind: input, shape index: {}]   ;;  %s746_s3 = inlined_call_operand.hbm [shape: f32[8,8,128], index: 3, kind: output, shape index: {}]  }
   0x1   :  { %9 = vsyncpa [#allocation7], 0  ;;  %s29_s14 = sshll.u32 %s744_s1, 4  ;;  %s30_s14 = int_to_ptr.hbm [resolvable:$true] %s29_s14 }
   0x2   :  { %10 = vsyncpa [#allocation5], 0  ;;  %s536_s15 = smov [#allocation6]   ;;  %s15_s19 = sshll.u32 %s743_s0, 4  ;;  %s16_s19 = int_to_ptr.hbm [resolvable:$true] %s15_s19 }
   0x3   :  { %s31_s16 = sshll.u32 %s536_s15, 4  ;;  %s537_s20 = smov [#allocation3]   ;;  %s32_s16 = int_to_ptr.vmem [resolvable:$true] %s31_s16 }
   0x4   :  { %34 = dma.hbm_to_vmem [thread:$0]  %s30_s14, 128, %s32_s16, [#allocation7]  }
   0x5   :  { %s17_s21 = sshll.u32 %s537_s20, 4  ;;  %s538_s22 = smov 128   ;;  %s18_s21 = int_to_ptr.vmem [resolvable:$true] %s17_s21 }
   0x6   :  { %s539_s23 = smov 8   ;;  %s39_s25 = sshll.u32 %s745_s2, 4  ;;  %s40_s25 = int_to_ptr.hbm [resolvable:$true] %s39_s25 }
   0x7   :  { %23 = dma.hbm_to_vmem [thread:$0]  %s16_s19, 1024, %s18_s21, [#allocation4], %s538_s22, %s538_s22, %s539_s23  }
   0x8   :  { %s540_s26 = smov [#allocation8]  }
   0x9   :  { %s41_s27 = sshll.u32 %s540_s26, 4  ;;  %s42_s27 = int_to_ptr.vmem [resolvable:$true] %s41_s27 }
   0xa   :  { %47 = dma.hbm_to_vmem [thread:$0]  %s40_s25, 2048, %s42_s27, [#allocation7], %s538_s22, %s538_s22, %s539_s23  }
   0xb   :  { %530 = dma.done.wait [#allocation4], 1024  }
   0xc   :  { %531 = vsyncadd [#allocation4], 4294966272 }
   0xd   :  { %532 = dma.done.wait [#allocation7], 2176  }
   0xe   :  { %533 = vsyncadd [#allocation7], 4294965120  ;;  %v577_v0 = vld [vmem:[#allocation8 + $0x78] sm:$0xff]  ;;  %v579_v1 = vld [vmem:[#allocation8 + $0x70] sm:$0xff]  ;;  %s541_s0 = smov [#allocation9]   ;;  %s414_s30 = sshll.u32 %s746_s3, 4  ;;  %s415_s30 = int_to_ptr.hbm [resolvable:$true] %s414_s30 }
   0xf   :  { %84 = vmatpush.msra.mxu0 %v577_v0  ;;  %126 = vmatpush.msra.mxu1 %v577_v0  ;;  %v583_v2 = vld [vmem:[#allocation8 + $0x68] sm:$0xff]  ;;  %v589_v3 = vld [vmem:[#allocation8 + $0x60] sm:$0xff]  ;;  %v595_v4 = vld [vmem:[#allocation8 + $0x58] sm:$0xff]  ;;  %s412_s2 = sshll.u32 %s541_s0, 4  ;;  %s413_s2 = int_to_ptr.vmem [resolvable:$true] %s412_s2 }
  0x10   :  { %169 = vmatpush.msra.mxu2 %v577_v0  ;;  %212 = vmatpush.msra.mxu3 %v577_v0  ;;  %v601_v5 = vld [vmem:[#allocation8 + $0x50] sm:$0xff]  ;;  %v607_v6 = vld [vmem:[#allocation8 + $0x48] sm:$0xff]  ;;  %v613_v7 = vld [vmem:[#allocation8 + $0x40] sm:$0xff] }
  0x11   :  { %85 = vmatpush.msra.mxu0 %v579_v1  ;;  %127 = vmatpush.msra.mxu1 %v579_v1  ;;  %v619_v8 = vld [vmem:[#allocation8 + $0x38] sm:$0xff]  ;;  %v625_v9 = vld [vmem:[#allocation8 + $0x30] sm:$0xff]  ;;  %v631_v10 = vld [vmem:[#allocation8 + $0x28] sm:$0xff] }
  0x12   :  { %170 = vmatpush.msra.mxu2 %v579_v1  ;;  %213 = vmatpush.msra.mxu3 %v579_v1  ;;  %v637_v11 = vld [vmem:[#allocation8 + $0x20] sm:$0xff]  ;;  %v643_v12 = vld [vmem:[#allocation8 + $0x18] sm:$0xff]  ;;  %v649_v13 = vld [vmem:[#allocation8 + $0x10] sm:$0xff] }
  0x13   :  { %86 = vmatpush.msra.mxu0 %v583_v2  ;;  %128 = vmatpush.msra.mxu1 %v583_v2  ;;  %v655_v14 = vld [vmem:[#allocation8 + $0x8] sm:$0xff]  ;;  %v661_v15 = vld [vmem:[#allocation8] sm:$0xff]  ;;  %v64_v16 = vld [vmem:[#allocation6] sm:$0xff] }
  0x14   :  { %171 = vmatpush.msra.mxu2 %v583_v2  ;;  %214 = vmatpush.msra.mxu3 %v583_v2  ;;  %v67_v17 = vld [vmem:[#allocation3] sm:$0xff]  ;;  %v109_v20 = vld [vmem:[#allocation3 + $0x8] sm:$0xff]  ;;  %v152_v23 = vld [vmem:[#allocation3 + $0x10] sm:$0xff] }
  0x15   :  { %87 = vmatpush.msra.mxu0 %v589_v3  ;;  %129 = vmatpush.msra.mxu1 %v589_v3  ;;  %v195_v26 = vld [vmem:[#allocation3 + $0x18] sm:$0xff]  ;;  %v238_v29 = vld [vmem:[#allocation3 + $0x20] sm:$0xff]  ;;  %v281_v32 = vld [vmem:[#allocation3 + $0x28] sm:$0xff] }
  0x16   :  { %172 = vmatpush.msra.mxu2 %v589_v3  ;;  %215 = vmatpush.msra.mxu3 %v589_v3  ;;  %v324_v35 = vld [vmem:[#allocation3 + $0x30] sm:$0xff]  ;;  %v367_v38 = vld [vmem:[#allocation3 + $0x38] sm:$0xff] }
  0x17   :  { %88 = vmatpush.msra.mxu0 %v595_v4  ;;  %130 = vmatpush.msra.mxu1 %v595_v4 }
  0x18   :  { %173 = vmatpush.msra.mxu2 %v595_v4  ;;  %216 = vmatpush.msra.mxu3 %v595_v4 }
  0x19   :  { %89 = vmatpush.msra.mxu0 %v601_v5  ;;  %131 = vmatpush.msra.mxu1 %v601_v5 }
  0x1a   :  { %174 = vmatpush.msra.mxu2 %v601_v5  ;;  %217 = vmatpush.msra.mxu3 %v601_v5 }
  0x1b   :  { %90 = vmatpush.msra.mxu0 %v607_v6  ;;  %132 = vmatpush.msra.mxu1 %v607_v6 }
  0x1c   :  { %175 = vmatpush.msra.mxu2 %v607_v6  ;;  %218 = vmatpush.msra.mxu3 %v607_v6 }
  0x1d   :  { %91 = vmatpush.msra.mxu0 %v613_v7  ;;  %133 = vmatpush.msra.mxu1 %v613_v7 }
  0x1e   :  { %176 = vmatpush.msra.mxu2 %v613_v7  ;;  %219 = vmatpush.msra.mxu3 %v613_v7 }
  0x1f   :  { %92 = vmatpush.msra.mxu0 %v619_v8  ;;  %134 = vmatpush.msra.mxu1 %v619_v8 }
  0x20   :  { %177 = vmatpush.msra.mxu2 %v619_v8  ;;  %220 = vmatpush.msra.mxu3 %v619_v8 }
  0x21   :  { %93 = vmatpush.msra.mxu0 %v625_v9  ;;  %135 = vmatpush.msra.mxu1 %v625_v9 }
  0x22   :  { %178 = vmatpush.msra.mxu2 %v625_v9  ;;  %221 = vmatpush.msra.mxu3 %v625_v9 }
  0x23   :  { %94 = vmatpush.msra.mxu0 %v631_v10  ;;  %136 = vmatpush.msra.mxu1 %v631_v10 }
  0x24   :  { %179 = vmatpush.msra.mxu2 %v631_v10  ;;  %222 = vmatpush.msra.mxu3 %v631_v10 }
  0x25   :  { %95 = vmatpush.msra.mxu0 %v637_v11  ;;  %137 = vmatpush.msra.mxu1 %v637_v11 }
  0x26   :  { %180 = vmatpush.msra.mxu2 %v637_v11  ;;  %223 = vmatpush.msra.mxu3 %v637_v11 }
  0x27   :  { %96 = vmatpush.msra.mxu0 %v643_v12  ;;  %138 = vmatpush.msra.mxu1 %v643_v12 }
  0x28   :  { %181 = vmatpush.msra.mxu2 %v643_v12  ;;  %224 = vmatpush.msra.mxu3 %v643_v12 }
  0x29   :  { %97 = vmatpush.msra.mxu0 %v649_v13  ;;  %139 = vmatpush.msra.mxu1 %v649_v13 }
  0x2a   :  { %182 = vmatpush.msra.mxu2 %v649_v13  ;;  %225 = vmatpush.msra.mxu3 %v649_v13 }
  0x2b   :  { %98 = vmatpush.msra.mxu0 %v655_v14  ;;  %140 = vmatpush.msra.mxu1 %v655_v14 }
  0x2c   :  { %183 = vmatpush.msra.mxu2 %v655_v14  ;;  %226 = vmatpush.msra.mxu3 %v655_v14 }
  0x2d   :  { %99 = vmatpush.msra.mxu0 %v661_v15  ;;  %141 = vmatpush.msra.mxu1 %v661_v15 }
  0x2e   :  { %100 = vmatmul.f32.vlgmr.msra.gmra.mxu0 %v64_v16  ;;  %184 = vmatpush.msra.mxu2 %v661_v15 }
  0x2f   :  { %227 = vmatpush.msra.mxu3 %v661_v15  ;;  %255 = vmatpush.msrb.mxu0 %v577_v0 }
  0x30   :  { %298 = vmatpush.msrb.mxu1 %v577_v0  ;;  %341 = vmatpush.msrb.mxu2 %v577_v0 }
  0x31   :  { %256 = vmatpush.msrb.mxu0 %v579_v1  ;;  %384 = vmatpush.msrb.mxu3 %v577_v0 }
  0x32   :  { %299 = vmatpush.msrb.mxu1 %v579_v1  ;;  %342 = vmatpush.msrb.mxu2 %v579_v1 }
  0x33   :  { %257 = vmatpush.msrb.mxu0 %v583_v2  ;;  %385 = vmatpush.msrb.mxu3 %v579_v1 }
  0x34   :  { %300 = vmatpush.msrb.mxu1 %v583_v2  ;;  %343 = vmatpush.msrb.mxu2 %v583_v2 }
  0x35   :  { %258 = vmatpush.msrb.mxu0 %v589_v3  ;;  %386 = vmatpush.msrb.mxu3 %v583_v2 }
  0x36   :  { %301 = vmatpush.msrb.mxu1 %v589_v3  ;;  %344 = vmatpush.msrb.mxu2 %v589_v3 }
  0x37   :  { %259 = vmatpush.msrb.mxu0 %v595_v4  ;;  %387 = vmatpush.msrb.mxu3 %v589_v3 }
  0x38   :  { %302 = vmatpush.msrb.mxu1 %v595_v4  ;;  %345 = vmatpush.msrb.mxu2 %v595_v4 }
  0x39   :  { %260 = vmatpush.msrb.mxu0 %v601_v5  ;;  %388 = vmatpush.msrb.mxu3 %v595_v4 }
  0x3a   :  { %303 = vmatpush.msrb.mxu1 %v601_v5  ;;  %346 = vmatpush.msrb.mxu2 %v601_v5 }
  0x3b   :  { %261 = vmatpush.msrb.mxu0 %v607_v6  ;;  %389 = vmatpush.msrb.mxu3 %v601_v5 }
  0x3c   :  { %304 = vmatpush.msrb.mxu1 %v607_v6  ;;  %347 = vmatpush.msrb.mxu2 %v607_v6 }
  0x3d   :  { %262 = vmatpush.msrb.mxu0 %v613_v7  ;;  %390 = vmatpush.msrb.mxu3 %v607_v6 }
  0x3e   :  { %305 = vmatpush.msrb.mxu1 %v613_v7  ;;  %348 = vmatpush.msrb.mxu2 %v613_v7 }
  0x3f   :  { %263 = vmatpush.msrb.mxu0 %v619_v8  ;;  %391 = vmatpush.msrb.mxu3 %v613_v7 }
  0x40   :  { %306 = vmatpush.msrb.mxu1 %v619_v8  ;;  %349 = vmatpush.msrb.mxu2 %v619_v8 }
  0x41   :  { %264 = vmatpush.msrb.mxu0 %v625_v9  ;;  %392 = vmatpush.msrb.mxu3 %v619_v8 }
  0x42   :  { %307 = vmatpush.msrb.mxu1 %v625_v9  ;;  %350 = vmatpush.msrb.mxu2 %v625_v9 }
  0x43   :  { %265 = vmatpush.msrb.mxu0 %v631_v10  ;;  %393 = vmatpush.msrb.mxu3 %v625_v9 }
  0x44   :  { %308 = vmatpush.msrb.mxu1 %v631_v10  ;;  %351 = vmatpush.msrb.mxu2 %v631_v10 }
  0x45   :  { %266 = vmatpush.msrb.mxu0 %v637_v11  ;;  %394 = vmatpush.msrb.mxu3 %v631_v10 }
  0x46   :  { %309 = vmatpush.msrb.mxu1 %v637_v11  ;;  %352 = vmatpush.msrb.mxu2 %v637_v11 }
  0x47   :  { %267 = vmatpush.msrb.mxu0 %v643_v12  ;;  %395 = vmatpush.msrb.mxu3 %v637_v11 }
  0x48   :  { %310 = vmatpush.msrb.mxu1 %v643_v12  ;;  %353 = vmatpush.msrb.mxu2 %v643_v12 }
  0x49   :  { %268 = vmatpush.msrb.mxu0 %v649_v13  ;;  %396 = vmatpush.msrb.mxu3 %v643_v12 }
  0x4a   :  { %311 = vmatpush.msrb.mxu1 %v649_v13  ;;  %354 = vmatpush.msrb.mxu2 %v649_v13 }
  0x4b   :  { %269 = vmatpush.msrb.mxu0 %v655_v14  ;;  %397 = vmatpush.msrb.mxu3 %v649_v13 }
  0x4c   :  { %312 = vmatpush.msrb.mxu1 %v655_v14  ;;  %355 = vmatpush.msrb.mxu2 %v655_v14 }
  0x4d   :  { %270 = vmatpush.msrb.mxu0 %v661_v15  ;;  %398 = vmatpush.msrb.mxu3 %v655_v14 }
  0x4e   :  { %313 = vmatpush.msrb.mxu1 %v661_v15  ;;  %356 = vmatpush.msrb.mxu2 %v661_v15 }
  0x4f   :  { %399 = vmatpush.msrb.mxu3 %v661_v15 }
  0xab   :  { %v101_v18 = vpop.f32.mrf.mxu0 }
  0xac   :  { %v104_v19 = vadd.f32 %v101_v18, %v67_v17 }
  0xae   :  { %106 = vst [vmem:[#allocation9] sm:$0xff] %v104_v19  ;;  %142 = vmatmul.f32.vlgmr.msra.gmra.mxu1 %v104_v19 }
 0x12b   :  { %v143_v21 = vpop.f32.mrf.mxu1 }
 0x12c   :  { %v146_v22 = vadd.f32 %v143_v21, %v109_v20 }
 0x12e   :  { %149 = vst [vmem:[#allocation9 + $0x8] sm:$0xff] %v146_v22  ;;  %185 = vmatmul.f32.vlgmr.msra.gmra.mxu2 %v146_v22 }
 0x1b1   :  { %v186_v24 = vpop.f32.mrf.mxu2 }
 0x1b2   :  { %v189_v25 = vadd.f32 %v186_v24, %v152_v23 }
 0x1b4   :  { %192 = vst [vmem:[#allocation9 + $0x10] sm:$0xff] %v189_v25  ;;  %228 = vmatmul.f32.vlgmr.msra.gmra.mxu3 %v189_v25 }
 0x237   :  { %v229_v27 = vpop.f32.mrf.mxu3 }
 0x238   :  { %v232_v28 = vadd.f32 %v229_v27, %v195_v26 }
 0x23a   :  { %235 = vst [vmem:[#allocation9 + $0x18] sm:$0xff] %v232_v28  ;;  %271 = vmatmul.f32.vlgmr.msrb.gmra.mxu0 %v232_v28 }
 0x2b7   :  { %v272_v30 = vpop.f32.mrf.mxu0 }
 0x2b8   :  { %v275_v31 = vadd.f32 %v272_v30, %v238_v29 }
 0x2ba   :  { %278 = vst [vmem:[#allocation9 + $0x20] sm:$0xff] %v275_v31  ;;  %314 = vmatmul.f32.vlgmr.msrb.gmra.mxu1 %v275_v31 }
 0x337   :  { %v315_v33 = vpop.f32.mrf.mxu1 }
 0x338   :  { %v318_v34 = vadd.f32 %v315_v33, %v281_v32 }
 0x33a   :  { %321 = vst [vmem:[#allocation9 + $0x28] sm:$0xff] %v318_v34  ;;  %357 = vmatmul.f32.vlgmr.msrb.gmra.mxu2 %v318_v34 }
 0x3bd   :  { %v358_v36 = vpop.f32.mrf.mxu2 }
 0x3be   :  { %v361_v37 = vadd.f32 %v358_v36, %v324_v35 }
 0x3c0   :  { %364 = vst [vmem:[#allocation9 + $0x30] sm:$0xff] %v361_v37  ;;  %400 = vmatmul.f32.vlgmr.msrb.gmra.mxu3 %v361_v37 }
 0x443   :  { %v401_v39 = vpop.f32.mrf.mxu3 }
 0x444   :  { %v404_v40 = vadd.f32 %v401_v39, %v367_v38 }
 0x446   :  { %407 = vst [vmem:[#allocation9 + $0x38] sm:$0xff] %v404_v40 }
 0x447   :  { %420 = dma.vmem_to_hbm [thread:$0]  %s413_s2, 1024, %s415_s30, [#allocation5], %s538_s22, %s538_s22, %s539_s23  }
 0x448   :  { %534 = dma.done.wait [#allocation5], 1024  }
 0x449   :  { %535 = vsyncadd [#allocation5], 4294966272 }
 0x44a   :  { %425 = vsyncpa [#allocation4], 1 }
 0x44b   :  { %426 = vsyncpa [#allocation7], 1 }
 0x44c   :  { %427 = vsyncpa [#allocation5], 1 }

</bundles_post_ra>
